<compile_context>
chip_gen: v6e
topology: v6e:2x2x1
jax: 0.10.0
libtpu: 0.0.40
codegen_flags: <defaults>
</compile_context>

<pallas_src>
import math
from functools import partial

import jax
import jax.numpy as jnp
from jax import lax
from jax.experimental import pallas as pl
from jax.experimental.pallas import tpu as pltpu


def _round_up(x, m):
    return ((x + m - 1) // m) * m


def _critic_kernel(state_ref, act_ref, ws_ref, wac_ref, wb_ref, wc1_ref,
                   wc2_ref, wqb_ref, out_ref, *, fc1, fc2, fc3, use_bf16):
    cdt = jnp.bfloat16 if use_bf16 else jnp.float32

    def dot_t(w, x):
        # w: (M, K), x: (N, K) -> (M, N); contracts the minor dim of both
        # operands (flash-attention's q @ k^T pattern).  Lets the streamed
        # activations stay batch-major while the compute is feature-major.
        return lax.dot_general(w.astype(cdt), x.astype(cdt),
                               dimension_numbers=(((1,), (1,)), ((), ())),
                               preferred_element_type=jnp.float32)

    def dot_f(w, x):
        # w: (M, K) @ x: (K, N) -> (M, N), f32 accumulation on the MXU.
        return jnp.dot(w.astype(cdt), x.astype(cdt),
                       preferred_element_type=jnp.float32)

    def lrelu(v):                          # F.leaky_relu default slope 0.01
        return jnp.where(v > 0, v, 0.01 * v)

    x_s = state_ref[...]                   # (TB, in_dim)     batch-major tile
    x_a = act_ref[...]                     # (TB, n_act + 1)  [action | 1]

    # Fused input layer (fc1 + action_value + carried ones row); b1/ba folded
    # through the ones column of x_a.  Output rows: [sv1 (fc1) ; 1 ; av (fc2)].
    h = lrelu(dot_t(ws_ref[...], x_s) + dot_t(wac_ref[...], x_a))   # (fc1+1+fc2, TB)

    # fc2 on the state path; b2 folded via the carried ones row:
    #   input [sv1 ; 1] = h[0 : fc1+1]  (contiguous slice, 8-aligned start).
    sv2 = lrelu(dot_f(wb_ref[...], h[0:fc1 + 1, :]))                # (fc2, TB)

    # fc3 on cat([av, sv2]): split into two dots so no concat copy is needed;
    # b3 rides on the [1 ; av] = h[fc1:] slice (start = fc1 = 64, 8-aligned).
    pre3 = dot_f(wc1_ref[...], h[fc1:, :]) + dot_f(wc2_ref[...], sv2)
    sav = jnp.maximum(pre3, 0.0)                                    # (fc3, TB)

    # q head: VPU multiply + sublane reduction (no N=1 MXU matmul); the result
    # is already lane-dense (1, TB).  Kept in f32 on every TPU generation.
    wqb = wqb_ref[...]                                              # (fc3+1, 1) f32
    q = jnp.sum(sav * wqb[0:fc3, :], axis=0, keepdims=True) + wqb[fc3:fc3 + 1, :]
    out_ref[...] = q


def critic_forward(state, action, params, *, batch_tile=2048, use_bf16=False):
    """CriticNetwork forward: state [B, input_dim], action [B, n_actions] -> q [B, 1]."""
    B, in_dim = state.shape
    n_act = action.shape[1]
    fc2, fc1p1 = params["wb"].shape
    fc1 = fc1p1 - 1
    fc3 = params["wc2"].shape[0]
    fca = fc1 + 1 + fc2

    f32 = jnp.float32
    state = state.astype(f32)
    # Fold the first-layer biases into the MXU by appending a ones column to
    # the (tiny) action input; downstream layers reuse the carried ones row.
    act_aug = jnp.concatenate([action.astype(f32), jnp.ones((B, 1), f32)], axis=1)

    # Batch tiling:
    #  * B <= batch_tile: single full-array block (no pad, no grid overhead).
    #  * B  > batch_tile: tiles that are multiples of 256 lanes; this always
    #    yields >= 2 tiles so the "parallel" axis shards across v7x's 2 TCs.
    if B <= batch_tile:
        tb, n_tiles, padded = B, 1, B
    else:
        n_min = pl.cdiv(B, batch_tile)
        tb = min(batch_tile, _round_up(pl.cdiv(B, n_min), 256))
        n_tiles = pl.cdiv(B, tb)
        padded = n_tiles * tb
    if padded > B:
        state = jnp.pad(state, ((0, padded - B), (0, 0)))
        act_aug = jnp.pad(act_aug, ((0, padded - B), (0, 0)))

    # Optional bf16 MXU operands (f32 accumulation / activation math kept).
    wdt = jnp.bfloat16 if use_bf16 else f32
    ws = params["ws"].astype(wdt)
    wac = params["wac"].astype(wdt)
    wb = params["wb"].astype(wdt)
    wc1 = params["wc1"].astype(wdt)
    wc2 = params["wc2"].astype(wdt)
    wqb = params["wqb"].astype(f32)        # q head stays on the VPU in f32

    kernel = partial(_critic_kernel, fc1=fc1, fc2=fc2, fc3=fc3, use_bf16=use_bf16)

    out = pl.pallas_call(
        kernel,
        out_shape=jax.ShapeDtypeStruct((1, padded), f32),
        grid=(n_tiles,),
        in_specs=[
            pl.BlockSpec((tb, in_dim), lambda i: (i, 0)),       # state tile (streamed)
            pl.BlockSpec((tb, n_act + 1), lambda i: (i, 0)),    # [action | 1] tile
            pl.BlockSpec((fca, in_dim), lambda i: (0, 0)),      # fused W, state cols (resident)
            pl.BlockSpec((fca, n_act + 1), lambda i: (0, 0)),   # fused W, action+bias cols
            pl.BlockSpec((fc2, fc1 + 1), lambda i: (0, 0)),     # [W2 | b2]
            pl.BlockSpec((fc3, 1 + fc2), lambda i: (0, 0)),     # [b3 | W3_av]
            pl.BlockSpec((fc3, fc2), lambda i: (0, 0)),         # W3_sv
            pl.BlockSpec((fc3 + 1, 1), lambda i: (0, 0)),       # [wq ; bq]
        ],
        out_specs=pl.BlockSpec((1, tb), lambda i: (0, i)),      # lane-dense q row
        compiler_params=pltpu.CompilerParams(
            dimension_semantics=("parallel",)),
    )(state, act_aug, ws, wac, wb, wc1, wc2, wqb)

    return out[0, :B].reshape(B, 1)


# ----------------------------- parameter init -------------------------------

def _xavier_uniform(key, shape, gain):
    fan_out, fan_in = shape                 # PyTorch (out_features, in_features)
    a = gain * math.sqrt(6.0 / (fan_in + fan_out))
    return jax.random.uniform(key, shape, jnp.float32, minval=-a, maxval=a)


def _torch_default_weight(key, shape):
    # nn.Linear default: kaiming_uniform(a=sqrt(5)) == U(-1/sqrt(fan_in), +)
    bound = 1.0 / math.sqrt(shape[1])
    return jax.random.uniform(key, shape, jnp.float32, minval=-bound, maxval=bound)


def _torch_default_bias(key, fan_in, out_features):
    bound = 1.0 / math.sqrt(fan_in)
    return jax.random.uniform(key, (out_features,), jnp.float32,
                              minval=-bound, maxval=bound)


def pack_kernel_params(p):
    """Pack PyTorch-layout weights/biases into the fused kernel operands."""
    fc1, in_dim = p["w1"].shape
    fc2 = p["w2"].shape[0]
    fc3 = p["w3"].shape[0]
    n_act = p["wa"].shape[1]
    f32 = jnp.float32

    def zeros(r, c):
        return jnp.zeros((r, c), f32)

    # Fused input layer, output rows ordered [sv1 (fc1) ; ones (1) ; av (fc2)].
    ws = jnp.concatenate([p["w1"], zeros(1 + fc2, in_dim)], axis=0)       # (fc1+1+fc2, in_dim)
    wac = jnp.concatenate([
        jnp.concatenate([zeros(fc1, n_act), p["b1"][:, None]], axis=1),   # b1 on ones col
        jnp.concatenate([zeros(1, n_act), jnp.ones((1, 1), f32)], axis=1),  # carried ones row
        jnp.concatenate([p["wa"], p["ba"][:, None]], axis=1),             # Wa + ba
    ], axis=0)                                                            # (fc1+1+fc2, n_act+1)
    wb = jnp.concatenate([p["w2"], p["b2"][:, None]], axis=1)             # acts on [sv1 ; 1]
    wc1 = jnp.concatenate([p["b3"][:, None], p["w3"][:, :fc2]], axis=1)   # acts on [1 ; av]
    wc2 = p["w3"][:, fc2:]                                                # acts on sv2
    wqb = jnp.concatenate([p["wq"].T, p["bq"][:, None]], axis=0)          # (fc3+1, 1)
    return dict(ws=ws, wac=wac, wb=wb, wc1=wc1, wc2=wc2, wqb=wqb)


def init_params(key, input_dim, fc1_dims, fc2_dims, fc3_dims, n_actions):
    gain = math.sqrt(2.0 / (1.0 + 0.01 ** 2))    # calculate_gain('leaky_relu')
    ks = jax.random.split(key, 10)
    p = {
        "w1": _xavier_uniform(ks[0], (fc1_dims, input_dim), gain),
        "w2": _xavier_uniform(ks[1], (fc2_dims, fc1_dims), gain),
        "wa": _xavier_uniform(ks[2], (fc2_dims, n_actions), gain),
        "w3": _xavier_uniform(ks[3], (fc3_dims, 2 * fc2_dims), gain),
        "wq": _torch_default_weight(ks[4], (1, fc3_dims)),     # q layer: torch default
        "b1": _torch_default_bias(ks[5], input_dim, fc1_dims),
        "b2": _torch_default_bias(ks[6], fc1_dims, fc2_dims),
        "ba": _torch_default_bias(ks[7], n_actions, fc2_dims),
        "b3": _torch_default_bias(ks[8], 2 * fc2_dims, fc3_dims),
        "bq": _torch_default_bias(ks[9], fc3_dims, 1),
    }
    p.update(pack_kernel_params(p))
    return p


def reference_forward(state, action, p):
    """Plain-JAX reference of the same forward pass (batch-major)."""
    def lrelu(x):
        return jnp.where(x > 0, x, 0.01 * x)

    sv = lrelu(state @ p["w1"].T + p["b1"])
    sv = lrelu(sv @ p["w2"].T + p["b2"])
    av = lrelu(action @ p["wa"].T + p["ba"])
    sav = jnp.concatenate([av, sv], axis=1)
    sav = jnp.maximum(sav @ p["w3"].T + p["b3"], 0.0)
    return sav @ p["wq"].T + p["bq"]


if __name__ == "__main__":
    # Shapes consistent with the module's constructor:
    #   input_dims=(32,), fc1_dims=64, fc2_dims=64, fc3_dims=32, n_actions=4
    B, IN_DIM, FC1, FC2, FC3, N_ACT = 2, 32, 64, 64, 32, 4

    key = jax.random.PRNGKey(0)
    kp, ks1, ka1, ks2, ka2 = jax.random.split(key, 5)

    params = init_params(kp, IN_DIM, FC1, FC2, FC3, N_ACT)
    fwd = jax.jit(critic_forward, static_argnames=("batch_tile", "use_bf16"))

    # 1) Small-batch fast path: one full-array block, no padding, no transpose.
    state = jax.random.normal(ks1, (B, IN_DIM), jnp.float32)
    action = jax.random.normal(ka1, (B, N_ACT), jnp.float32)
    q = jax.block_until_ready(fwd(state, action, params))
    q_ref = reference_forward(state, action, params)
    assert q.shape == (B, 1)
    assert jnp.allclose(q, q_ref, atol=1e-3, rtol=1e-3)

    # 2) Multi-tile path (3 x 256-row tiles with batch padding), f32 parity.
    B2 = 600
    state2 = jax.random.normal(ks2, (B2, IN_DIM), jnp.float32)
    action2 = jax.random.normal(ka2, (B2, N_ACT), jnp.float32)
    q2 = jax.block_until_ready(fwd(state2, action2, params, batch_tile=256))
    q2_ref = reference_forward(state2, action2, params)
    assert q2.shape == (B2, 1)
    assert jnp.allclose(q2, q2_ref, atol=1e-3, rtol=1e-3)

    # 3) bf16 MXU operands (f32 accumulation) — tolerance smoke test.
    q2_bf16 = jax.block_until_ready(
        fwd(state2, action2, params, batch_tile=256, use_bf16=True))
    assert float(jnp.max(jnp.abs(q2_bf16 - q2_ref))) < 0.25

    print("KERNEL_OK")
</pallas_src>

<mosaic_0001>
module attributes {stable_mosaic.version = 11 : i64} {
  func.func @_critic_kernel(%arg0: i32, %arg1: memref<2x32xf32, #tpu.memory_space<vmem>>, %arg2: memref<2x5xf32, #tpu.memory_space<vmem>>, %arg3: memref<129x32xf32, #tpu.memory_space<vmem>>, %arg4: memref<129x5xf32, #tpu.memory_space<vmem>>, %arg5: memref<64x65xf32, #tpu.memory_space<vmem>>, %arg6: memref<32x65xf32, #tpu.memory_space<vmem>>, %arg7: memref<32x64xf32, #tpu.memory_space<vmem>>, %arg8: memref<33x1xf32, #tpu.memory_space<vmem>>, %arg9: memref<1x2xf32, #tpu.memory_space<vmem>>) attributes {dimension_semantics = [#tpu.dimension_semantics<parallel>], iteration_bounds = array<i64: 1>, scalar_prefetch = 0 : i64, scratch_operands = 0 : i64, tpu.core_type = #tpu.core_type<tc>, window_params = [{transform_indices = @transform_0, window_bounds = array<i64: 2, 32>}, {transform_indices = @transform_1, window_bounds = array<i64: 2, 5>}, {pipeline_mode = #tpu.pipeline_mode<synchronous>, transform_indices = @transform_2, window_bounds = array<i64: 129, 32>}, {pipeline_mode = #tpu.pipeline_mode<synchronous>, transform_indices = @transform_3, window_bounds = array<i64: 129, 5>}, {pipeline_mode = #tpu.pipeline_mode<synchronous>, transform_indices = @transform_4, window_bounds = array<i64: 64, 65>}, {pipeline_mode = #tpu.pipeline_mode<synchronous>, transform_indices = @transform_5, window_bounds = array<i64: 32, 65>}, {pipeline_mode = #tpu.pipeline_mode<synchronous>, transform_indices = @transform_6, window_bounds = array<i64: 32, 64>}, {pipeline_mode = #tpu.pipeline_mode<synchronous>, transform_indices = @transform_7, window_bounds = array<i64: 33, 1>}, {transform_indices = @transform_8, window_bounds = array<i64: 1, 2>}]} {
    %c0 = arith.constant 0 : index
    %c0_0 = arith.constant 0 : index
    %0 = vector.load %arg1[%c0, %c0_0] : memref<2x32xf32, #tpu.memory_space<vmem>>, vector<2x32xf32>
    %c0_1 = arith.constant 0 : index
    %c0_2 = arith.constant 0 : index
    %1 = vector.load %arg2[%c0_1, %c0_2] : memref<2x5xf32, #tpu.memory_space<vmem>>, vector<2x5xf32>
    %c0_3 = arith.constant 0 : index
    %c0_4 = arith.constant 0 : index
    %2 = vector.load %arg3[%c0_3, %c0_4] : memref<129x32xf32, #tpu.memory_space<vmem>>, vector<129x32xf32>
    %cst = arith.constant dense<0.000000e+00> : vector<129x2xf32>
    %3 = tpu.matmul %2, %0, %cst {dimension_numbers = #tpu.dot_dimension_numbers<[1], [1], [0], [0], [0, 0, 1, 0], [], []>} : vector<129x32xf32>, vector<2x32xf32>, vector<129x2xf32> -> vector<129x2xf32>
    %c0_5 = arith.constant 0 : index
    %c0_6 = arith.constant 0 : index
    %4 = vector.load %arg4[%c0_5, %c0_6] : memref<129x5xf32, #tpu.memory_space<vmem>>, vector<129x5xf32>
    %cst_7 = arith.constant dense<0.000000e+00> : vector<129x2xf32>
    %5 = tpu.matmul %4, %1, %cst_7 {dimension_numbers = #tpu.dot_dimension_numbers<[1], [1], [0], [0], [0, 0, 1, 0], [], []>} : vector<129x5xf32>, vector<2x5xf32>, vector<129x2xf32> -> vector<129x2xf32>
    %6 = arith.addf %3, %5 : vector<129x2xf32>
    %cst_8 = arith.constant 0.000000e+00 : f32
    %7 = vector.broadcast %cst_8 : f32 to vector<129x2xf32>
    %8 = arith.cmpf ogt, %6, %7 : vector<129x2xf32>
    %cst_9 = arith.constant 0.00999999977 : f32
    %9 = vector.broadcast %cst_9 : f32 to vector<129x2xf32>
    %10 = arith.mulf %9, %6 : vector<129x2xf32>
    %11 = arith.select %8, %6, %10 : vector<129x2xi1>, vector<129x2xf32>
    %c0_10 = arith.constant 0 : index
    %c0_11 = arith.constant 0 : index
    %12 = vector.load %arg5[%c0_10, %c0_11] : memref<64x65xf32, #tpu.memory_space<vmem>>, vector<64x65xf32>
    %13 = vector.extract_strided_slice %11 {offsets = [0, 0], sizes = [65, 2], strides = [1, 1]} : vector<129x2xf32> to vector<65x2xf32>
    %cst_12 = arith.constant dense<0.000000e+00> : vector<64x2xf32>
    %14 = tpu.matmul %12, %13, %cst_12 {dimension_numbers = #tpu.dot_dimension_numbers<[1], [0], [0], [1], [0, 0, 1, 1], [], []>} : vector<64x65xf32>, vector<65x2xf32>, vector<64x2xf32> -> vector<64x2xf32>
    %cst_13 = arith.constant 0.000000e+00 : f32
    %15 = vector.broadcast %cst_13 : f32 to vector<64x2xf32>
    %16 = arith.cmpf ogt, %14, %15 : vector<64x2xf32>
    %cst_14 = arith.constant 0.00999999977 : f32
    %17 = vector.broadcast %cst_14 : f32 to vector<64x2xf32>
    %18 = arith.mulf %17, %14 : vector<64x2xf32>
    %19 = arith.select %16, %14, %18 : vector<64x2xi1>, vector<64x2xf32>
    %c0_15 = arith.constant 0 : index
    %c0_16 = arith.constant 0 : index
    %20 = vector.load %arg6[%c0_15, %c0_16] : memref<32x65xf32, #tpu.memory_space<vmem>>, vector<32x65xf32>
    %21 = vector.extract_strided_slice %11 {offsets = [64, 0], sizes = [65, 2], strides = [1, 1]} : vector<129x2xf32> to vector<65x2xf32>
    %cst_17 = arith.constant dense<0.000000e+00> : vector<32x2xf32>
    %22 = tpu.matmul %20, %21, %cst_17 {dimension_numbers = #tpu.dot_dimension_numbers<[1], [0], [0], [1], [0, 0, 1, 1], [], []>} : vector<32x65xf32>, vector<65x2xf32>, vector<32x2xf32> -> vector<32x2xf32>
    %c0_18 = arith.constant 0 : index
    %c0_19 = arith.constant 0 : index
    %23 = vector.load %arg7[%c0_18, %c0_19] : memref<32x64xf32, #tpu.memory_space<vmem>>, vector<32x64xf32>
    %cst_20 = arith.constant dense<0.000000e+00> : vector<32x2xf32>
    %24 = tpu.matmul %23, %19, %cst_20 {dimension_numbers = #tpu.dot_dimension_numbers<[1], [0], [0], [1], [0, 0, 1, 1], [], []>} : vector<32x64xf32>, vector<64x2xf32>, vector<32x2xf32> -> vector<32x2xf32>
    %25 = arith.addf %22, %24 : vector<32x2xf32>
    %cst_21 = arith.constant 0.000000e+00 : f32
    %26 = vector.broadcast %cst_21 : f32 to vector<32x2xf32>
    %27 = arith.maximumf %25, %26 : vector<32x2xf32>
    %c0_22 = arith.constant 0 : index
    %c0_23 = arith.constant 0 : index
    %28 = vector.load %arg8[%c0_22, %c0_23] : memref<33x1xf32, #tpu.memory_space<vmem>>, vector<33x1xf32>
    %29 = vector.extract_strided_slice %28 {offsets = [0, 0], sizes = [32, 1], strides = [1, 1]} : vector<33x1xf32> to vector<32x1xf32>
    %30 = vector.broadcast %29 : vector<32x1xf32> to vector<32x2xf32>
    %31 = arith.mulf %27, %30 : vector<32x2xf32>
    %cst_24 = arith.constant dense<0.000000e+00> : vector<2xf32>
    %32 = vector.multi_reduction <add>, %31, %cst_24 [0] : vector<32x2xf32> to vector<2xf32>
    %33 = vector.shape_cast %32 : vector<2xf32> to vector<1x2xf32>
    %34 = vector.extract_strided_slice %28 {offsets = [32, 0], sizes = [1, 1], strides = [1, 1]} : vector<33x1xf32> to vector<1x1xf32>
    %35 = vector.broadcast %34 : vector<1x1xf32> to vector<1x2xf32>
    %36 = arith.addf %33, %35 : vector<1x2xf32>
    %c0_25 = arith.constant 0 : index
    %c0_26 = arith.constant 0 : index
    %37 = vector.load %arg9[%c0_25, %c0_26] : memref<1x2xf32, #tpu.memory_space<vmem>>, vector<1x2xf32>
    tpu.vector_store %arg9[%c0_25, %c0_26], %36 {strides = array<i32>} : memref<1x2xf32, #tpu.memory_space<vmem>>, vector<1x2xf32>,
    return
  }
  func.func @transform_0(%arg0: i32) -> (i32, i32) {
    %c0_i32 = arith.constant 0 : i32
    %c0_i32_0 = arith.constant 0 : i32
    return %arg0, %c0_i32 : i32, i32
  }
  func.func @transform_1(%arg0: i32) -> (i32, i32) {
    %c0_i32 = arith.constant 0 : i32
    %c0_i32_0 = arith.constant 0 : i32
    return %arg0, %c0_i32 : i32, i32
  }
  func.func @transform_2(%arg0: i32) -> (i32, i32) {
    %c0_i32 = arith.constant 0 : i32
    %c0_i32_0 = arith.constant 0 : i32
    %c0_i32_1 = arith.constant 0 : i32
    return %c0_i32, %c0_i32_0 : i32, i32
  }
  func.func @transform_3(%arg0: i32) -> (i32, i32) {
    %c0_i32 = arith.constant 0 : i32
    %c0_i32_0 = arith.constant 0 : i32
    %c0_i32_1 = arith.constant 0 : i32
    return %c0_i32, %c0_i32_0 : i32, i32
  }
  func.func @transform_4(%arg0: i32) -> (i32, i32) {
    %c0_i32 = arith.constant 0 : i32
    %c0_i32_0 = arith.constant 0 : i32
    %c0_i32_1 = arith.constant 0 : i32
    return %c0_i32, %c0_i32_0 : i32, i32
  }
  func.func @transform_5(%arg0: i32) -> (i32, i32) {
    %c0_i32 = arith.constant 0 : i32
    %c0_i32_0 = arith.constant 0 : i32
    %c0_i32_1 = arith.constant 0 : i32
    return %c0_i32, %c0_i32_0 : i32, i32
  }
  func.func @transform_6(%arg0: i32) -> (i32, i32) {
    %c0_i32 = arith.constant 0 : i32
    %c0_i32_0 = arith.constant 0 : i32
    %c0_i32_1 = arith.constant 0 : i32
    return %c0_i32, %c0_i32_0 : i32, i32
  }
  func.func @transform_7(%arg0: i32) -> (i32, i32) {
    %c0_i32 = arith.constant 0 : i32
    %c0_i32_0 = arith.constant 0 : i32
    %c0_i32_1 = arith.constant 0 : i32
    return %c0_i32, %c0_i32_0 : i32, i32
  }
  func.func @transform_8(%arg0: i32) -> (i32, i32) {
    %c0_i32 = arith.constant 0 : i32
    %c0_i32_0 = arith.constant 0 : i32
    return %c0_i32, %arg0 : i32, i32
  }
}

</mosaic_0001>

<bundles_post_ra>
// kernel: critic_forward.1
= control target key start
LH: loop header
LB: loop body
LE: loop exit
PB: predicated region body
PF: predicated region fallthrough
CT: control target
= control target key end

     0   :  { %vm66_vm0 = vcmask 39936   ;;  %v1312_v1 = vmov 0.0   ;;  %vm1313_vm1 = vmmov 0   ;;  %vm271_vm2 = vcmask 261120   ;;  %s1708_s0 = inlined_call_operand.vmem [shape: f32[2,32], index: 0, kind: input, shape index: {}]   ;;  %s1709_s1 = inlined_call_operand.vmem [shape: f32[2,5], index: 1, kind: input, shape index: {}]   ;;  %s1710_s2 = inlined_call_operand.vmem [shape: f32[129,32], index: 2, kind: input, shape index: {}]   ;;  %s1711_s3 = inlined_call_operand.vmem [shape: f32[129,5], index: 3, kind: input, shape index: {}]   ;;  %s1712_s4 = inlined_call_operand.vmem [shape: f32[64,65], index: 4, kind: input, shape index: {}]   ;;  %s1713_s5 = inlined_call_operand.vmem [shape: f32[32,65], index: 5, kind: input, shape index: {}]   ;;  %s1714_s6 = inlined_call_operand.vmem [shape: f32[32,64], index: 6, kind: input, shape index: {}]   ;;  %s1715_s7 = inlined_call_operand.vmem [shape: f32[33,1], index: 7, kind: input, shape index: {}]   ;;  %s1716_s8 = inlined_call_operand.hbm [shape: f32[1,2], index: 8, kind: output, shape index: {}]  }
   0x1   :  { %v31_v0 = vld [vmem:[%s1709_s1] sm:$0x3]  ;;  %1282 = vmatprep.subr.mxu1 %v1312_v1  ;;  %1147 = vmatprep.mubr.msk.f32.mxu1 %vm1313_vm1, %v1312_v1  ;;  %v64_v2 = vld [vmem:[%s1711_s3 + $0x78] sm:$0xff]  ;;  %v50_v6 = vld [vmem:[%s1711_s3 + $0x8] sm:$0xff] }
   0x2   :  { %1283 = vmatpush3.xpose.msk.msra.mxu1 %vm66_vm0, %v31_v0  ;;  %1100 = vmatprep.subr.mxu0 %v1312_v1  ;;  %v30_v3 = vld [vmem:[%s1708_s0] sm:$0x3]  ;;  %v51_v8 = vld [vmem:[%s1711_s3 + $0x10] sm:$0xff] }
   0x3   :  { %1101 = vmatpush3.xpose.msk.msra.mxu0 %vm66_vm0, %v31_v0  ;;  %1153 = vmatprep.subr.mxu1 %v1312_v1  ;;  %v49_v4 = vld [vmem:[%s1711_s3] sm:$0xff] }
   0x4   :  { %1102 = vmatprep.mubr.msk.f32.mxu0 %vm1313_vm1, %v1312_v1  ;;  %v65_v5 = vld [vmem:[%s1711_s3 + $0x80] sm:$0x1] }
   0x5   :  { %1148 = vmatmul.mubr.msk.f32.vlgmr.msra.gmra.mxu1 %vm66_vm0, %v64_v2  ;;  %v32_v7 = vld [vmem:[%s1710_s2] sm:$0xff] }
   0x6   :  { %1150 = vmatprep.mubr.msk.f32.mxu1 %vm1313_vm1, %v1312_v1  ;;  %1154 = vmatpush3.xpose.msk.msra.mxu1 %vm271_vm2, %v30_v3 }
   0x7   :  { %1103 = vmatmul.mubr.msk.f32.vlgmr.msra.gmra.mxu0 %vm66_vm0, %v49_v4 }
   0x8   :  { %1105 = vmatprep.mubr.msk.f32.mxu0 %vm1313_vm1, %v1312_v1 }
   0x9   :  { %1151 = vmatmul.mubr.msk.f32.gmra.mxu1 %vm66_vm0, %v65_v5 }
   0xa   :  { %1155 = vmatprep.mubr.msk.f32.mxu1 %vm1313_vm1, %v1312_v1 }
   0xb   :  { %1106 = vmatmul.mubr.msk.f32.gmra.mxu0 %vm66_vm0, %v50_v6 }
   0xc   :  { %1108 = vmatprep.mubr.msk.f32.mxu0 %vm1313_vm1, %v1312_v1 }
   0xd   :  { %13 = vsyncpa [#allocation3], 0  ;;  %1156 = vmatmul.mubr.msk.f32.vlgmr.msra.gmra.mxu1 %vm271_vm2, %v32_v7  ;;  %v33_v9 = vld [vmem:[%s1710_s2 + $0x8] sm:$0xff]  ;;  %v52_v10 = vld [vmem:[%s1711_s3 + $0x18] sm:$0xff]  ;;  %vm535_vm3 = vcmask 531456   ;;  %vm560_vm4 = vcmask 1040384  }
   0xe   :  { %1158 = vmatprep.mubr.msk.f32.mxu1 %vm1313_vm1, %v1312_v1  ;;  %v34_v11 = vld [vmem:[%s1710_s2 + $0x10] sm:$0xff]  ;;  %v53_v12 = vld [vmem:[%s1711_s3 + $0x20] sm:$0xff]  ;;  %v35_v13 = vld [vmem:[%s1710_s2 + $0x18] sm:$0xff] }
   0xf   :  { %1109 = vmatmul.mubr.msk.f32.gmra.mxu0 %vm66_vm0, %v51_v8  ;;  %v54_v14 = vld [vmem:[%s1711_s3 + $0x28] sm:$0xff]  ;;  %v36_v15 = vld [vmem:[%s1710_s2 + $0x20] sm:$0xff]  ;;  %v55_v16 = vld [vmem:[%s1711_s3 + $0x30] sm:$0xff] }
  0x10   :  { %1111 = vmatprep.mubr.msk.f32.mxu0 %vm1313_vm1, %v1312_v1  ;;  %v37_v17 = vld [vmem:[%s1710_s2 + $0x28] sm:$0xff]  ;;  %v56_v18 = vld [vmem:[%s1711_s3 + $0x38] sm:$0xff]  ;;  %v38_v19 = vld [vmem:[%s1710_s2 + $0x30] sm:$0xff] }
  0x11   :  { %1159 = vmatmul.mubr.msk.f32.gmra.mxu1 %vm271_vm2, %v33_v9  ;;  %v57_v20 = vld [vmem:[%s1711_s3 + $0x40] sm:$0xff]  ;;  %v39_v21 = vld [vmem:[%s1710_s2 + $0x38] sm:$0xff]  ;;  %v58_v22 = vld [vmem:[%s1711_s3 + $0x48] sm:$0xff] }
  0x12   :  { %1161 = vmatprep.mubr.msk.f32.mxu1 %vm1313_vm1, %v1312_v1  ;;  %v40_v23 = vld [vmem:[%s1710_s2 + $0x40] sm:$0xff]  ;;  %v59_v24 = vld [vmem:[%s1711_s3 + $0x50] sm:$0xff]  ;;  %v41_v25 = vld [vmem:[%s1710_s2 + $0x48] sm:$0xff] }
  0x13   :  { %1112 = vmatmul.mubr.msk.f32.gmra.mxu0 %vm66_vm0, %v52_v10  ;;  %v60_v26 = vld [vmem:[%s1711_s3 + $0x58] sm:$0xff]  ;;  %v42_v27 = vld [vmem:[%s1710_s2 + $0x50] sm:$0xff]  ;;  %v61_v28 = vld [vmem:[%s1711_s3 + $0x60] sm:$0xff] }
  0x14   :  { %1114 = vmatprep.mubr.msk.f32.mxu0 %vm1313_vm1, %v1312_v1  ;;  %v43_v29 = vld [vmem:[%s1710_s2 + $0x58] sm:$0xff]  ;;  %v62_v30 = vld [vmem:[%s1711_s3 + $0x68] sm:$0xff]  ;;  %v44_v31 = vld [vmem:[%s1710_s2 + $0x60] sm:$0xff] }
  0x15   :  { %1162 = vmatmul.mubr.msk.f32.gmra.mxu1 %vm271_vm2, %v34_v11  ;;  %v63_v32 = vld [vmem:[%s1711_s3 + $0x70] sm:$0xff]  ;;  %v45_v33 = vld [vmem:[%s1710_s2 + $0x68] sm:$0xff]  ;;  %v47_v35 = vld [vmem:[%s1710_s2 + $0x78] sm:$0xff] }
  0x16   :  { %1164 = vmatprep.mubr.msk.f32.mxu1 %vm1313_vm1, %v1312_v1  ;;  %v46_v34 = vld [vmem:[%s1710_s2 + $0x70] sm:$0xff]  ;;  %v48_v36 = vld [vmem:[%s1710_s2 + $0x80] sm:$0x1] }
  0x17   :  { %1115 = vmatmul.mubr.msk.f32.gmra.mxu0 %vm66_vm0, %v53_v12  ;;  %v527_v37 = vld [vmem:[%s1712_s4] sm:$0xff] }
  0x18   :  { %1117 = vmatprep.mubr.msk.f32.mxu0 %vm1313_vm1, %v1312_v1 }
  0x19   :  { %1165 = vmatmul.mubr.msk.f32.gmra.mxu1 %vm271_vm2, %v35_v13 }
  0x1a   :  { %1167 = vmatprep.mubr.msk.f32.mxu1 %vm1313_vm1, %v1312_v1 }
  0x1b   :  { %1118 = vmatmul.mubr.msk.f32.gmra.mxu0 %vm66_vm0, %v54_v14 }
  0x1c   :  { %1120 = vmatprep.mubr.msk.f32.mxu0 %vm1313_vm1, %v1312_v1 }
  0x1d   :  { %1168 = vmatmul.mubr.msk.f32.gmra.mxu1 %vm271_vm2, %v36_v15 }
  0x1e   :  { %1170 = vmatprep.mubr.msk.f32.mxu1 %vm1313_vm1, %v1312_v1 }
  0x1f   :  { %1121 = vmatmul.mubr.msk.f32.gmra.mxu0 %vm66_vm0, %v55_v16 }
  0x20   :  { %1123 = vmatprep.mubr.msk.f32.mxu0 %vm1313_vm1, %v1312_v1 }
  0x21   :  { %1171 = vmatmul.mubr.msk.f32.gmra.mxu1 %vm271_vm2, %v37_v17 }
  0x22   :  { %1173 = vmatprep.mubr.msk.f32.mxu1 %vm1313_vm1, %v1312_v1 }
  0x23   :  { %1124 = vmatmul.mubr.msk.f32.gmra.mxu0 %vm66_vm0, %v56_v18 }
  0x24   :  { %1126 = vmatprep.mubr.msk.f32.mxu0 %vm1313_vm1, %v1312_v1 }
  0x25   :  { %1174 = vmatmul.mubr.msk.f32.gmra.mxu1 %vm271_vm2, %v38_v19 }
  0x26   :  { %1176 = vmatprep.mubr.msk.f32.mxu1 %vm1313_vm1, %v1312_v1 }
  0x27   :  { %1127 = vmatmul.mubr.msk.f32.gmra.mxu0 %vm66_vm0, %v57_v20 }
  0x28   :  { %1129 = vmatprep.mubr.msk.f32.mxu0 %vm1313_vm1, %v1312_v1 }
  0x29   :  { %1177 = vmatmul.mubr.msk.f32.gmra.mxu1 %vm271_vm2, %v39_v21 }
  0x2a   :  { %1179 = vmatprep.mubr.msk.f32.mxu1 %vm1313_vm1, %v1312_v1 }
  0x2b   :  { %1130 = vmatmul.mubr.msk.f32.gmra.mxu0 %vm66_vm0, %v58_v22 }
  0x2c   :  { %1132 = vmatprep.mubr.msk.f32.mxu0 %vm1313_vm1, %v1312_v1 }
  0x2d   :  { %1180 = vmatmul.mubr.msk.f32.gmra.mxu1 %vm271_vm2, %v40_v23 }
  0x2e   :  { %1182 = vmatprep.mubr.msk.f32.mxu1 %vm1313_vm1, %v1312_v1 }
  0x2f   :  { %1133 = vmatmul.mubr.msk.f32.gmra.mxu0 %vm66_vm0, %v59_v24 }
  0x30   :  { %1135 = vmatprep.mubr.msk.f32.mxu0 %vm1313_vm1, %v1312_v1 }
  0x31   :  { %1183 = vmatmul.mubr.msk.f32.gmra.mxu1 %vm271_vm2, %v41_v25 }
  0x32   :  { %1185 = vmatprep.mubr.msk.f32.mxu1 %vm1313_vm1, %v1312_v1 }
  0x33   :  { %1136 = vmatmul.mubr.msk.f32.gmra.mxu0 %vm66_vm0, %v60_v26 }
  0x34   :  { %1138 = vmatprep.mubr.msk.f32.mxu0 %vm1313_vm1, %v1312_v1 }
  0x35   :  { %1186 = vmatmul.mubr.msk.f32.gmra.mxu1 %vm271_vm2, %v42_v27 }
  0x36   :  { %1188 = vmatprep.mubr.msk.f32.mxu1 %vm1313_vm1, %v1312_v1 }
  0x37   :  { %1139 = vmatmul.mubr.msk.f32.gmra.mxu0 %vm66_vm0, %v61_v28 }
  0x38   :  { %1141 = vmatprep.mubr.msk.f32.mxu0 %vm1313_vm1, %v1312_v1 }
  0x39   :  { %1189 = vmatmul.mubr.msk.f32.gmra.mxu1 %vm271_vm2, %v43_v29 }
  0x3a   :  { %1191 = vmatprep.mubr.msk.f32.mxu1 %vm1313_vm1, %v1312_v1 }
  0x3b   :  { %1142 = vmatmul.mubr.msk.f32.gmra.mxu0 %vm66_vm0, %v62_v30 }
  0x3c   :  { %1144 = vmatprep.mubr.msk.f32.mxu0 %vm1313_vm1, %v1312_v1 }
  0x3d   :  { %1192 = vmatmul.mubr.msk.f32.gmra.mxu1 %vm271_vm2, %v44_v31 }
  0x3e   :  { %1194 = vmatprep.mubr.msk.f32.mxu1 %vm1313_vm1, %v1312_v1 }
  0x3f   :  { %1145 = vmatmul.mubr.msk.f32.gmra.mxu0 %vm66_vm0, %v63_v32 }
  0x40   :  { %1224 = vmatprep.mubr.msk.f32.mxu0 %vm535_vm3, %v527_v37 }
  0x41   :  { %1195 = vmatmul.mubr.msk.f32.gmra.mxu1 %vm271_vm2, %v45_v33 }
  0x42   :  { %1197 = vmatprep.mubr.msk.f32.mxu1 %vm1313_vm1, %v1312_v1 }
  0x45   :  { %1198 = vmatmul.mubr.msk.f32.gmra.mxu1 %vm271_vm2, %v46_v34 }
  0x46   :  { %1200 = vmatprep.mubr.msk.f32.mxu1 %vm1313_vm1, %v1312_v1 }
  0x49   :  { %1201 = vmatmul.mubr.msk.f32.gmra.mxu1 %vm271_vm2, %v47_v35 }
  0x4a   :  { %1203 = vmatprep.mubr.msk.f32.mxu1 %vm1313_vm1, %v1312_v1 }
  0x4d   :  { %1204 = vmatmul.mubr.msk.f32.gmra.mxu1 %vm271_vm2, %v48_v36 }
  0xc5   :  { %v1581_v38 = vpop.f32.mrf.mxu1 }
  0xc7   :  { %v1149_v39 = vpop.f32.mrf.mxu1  ;;  %v1583_v40 = vpop.f32.mrf.mxu0 }
  0xc9   :  { %v1585_v41 = vpop.f32.mrf.mxu1  ;;  %v1104_v42 = vpop.f32.mrf.mxu0 }
  0xcb   :  { %v1152_v43 = vpop.f32.mrf.mxu1  ;;  %v1587_v44 = vpop.f32.mrf.mxu0 }
  0xcd   :  { %v1589_v45 = vpop.f32.mrf.mxu1  ;;  %v1107_v46 = vpop.f32.mrf.mxu0 }
  0xcf   :  { %v1157_v47 = vpop.f32.mrf.mxu1  ;;  %v197_v48 = vpop.f32.mrf.mxu0 }
  0xd1   :  { %v1591_v49 = vpop.f32.mrf.mxu1  ;;  %v1110_v50 = vpop.f32.mrf.mxu0 }
  0xd2   :  { %v398_v43 = vadd.f32 %v1591_v49, %v1587_v44 }
  0xd3   :  { %v1160_v51 = vpop.f32.mrf.mxu1  ;;  %v202_v52 = vpop.f32.mrf.mxu0 }
  0xd4   :  { %vm477_vm12 = vcmp.gt.f32.partialorder %v398_v43, 0.0 }
  0xd5   :  { %v402_v53 = vpop.f32.mrf.mxu1  ;;  %v1113_v54 = vpop.f32.mrf.mxu0 }
  0xd6   :  { %v403_v35 = vadd.f32 %v402_v53, %v197_v48  ;;  %v393_v48 = vadd.f32 %v1589_v45, %v1583_v40 }
  0xd7   :  { %v1163_v55 = vpop.f32.mrf.mxu1  ;;  %v207_v56 = vpop.f32.mrf.mxu0 }
  0xd8   :  { %vm478_vm11 = vcmp.gt.f32.partialorder %v403_v35, 0.0  ;;  %vm476_vm13 = vcmp.gt.f32.partialorder %v393_v48, 0.0 }
  0xd9   :  { %v407_v57 = vpop.f32.mrf.mxu1  ;;  %v1116_v58 = vpop.f32.mrf.mxu0 }
  0xda   :  { %v408_v30 = vadd.f32 %v407_v57, %v202_v52  ;;  %v495_v52 = vmul.f32 0.01, %v403_v35  ;;  %v493_v58 = vmul.f32 0.01, %v393_v48 }
  0xdb   :  { %v1166_v59 = vpop.f32.mrf.mxu1  ;;  %v212_v60 = vpop.f32.mrf.mxu0 }
  0xdc   :  { %v496_v46 = vmul.f32 0.01, %v408_v30  ;;  %vm479_vm10 = vcmp.gt.f32.partialorder %v408_v30, 0.0  ;;  %v512_v59 = vsel %vm478_vm11, %v403_v35, %v495_v52  ;;  %v907_v52 = vld [vmem:[%s1715_s7 + $0x20] sm:$0x1] }
  0xdd   :  { %v412_v61 = vpop.f32.mrf.mxu1  ;;  %v1119_v62 = vpop.f32.mrf.mxu0 }
  0xde   :  { %v413_v25 = vadd.f32 %v412_v61, %v207_v56  ;;  %v494_v56 = vmul.f32 0.01, %v398_v43  ;;  %v513_v44 = vsel %vm479_vm10, %v408_v30, %v496_v46  ;;  %v903_v46 = vld [vmem:[%s1715_s7] sm:$0xff] }
  0xdf   :  { %v1169_v63 = vpop.f32.mrf.mxu1  ;;  %v217_v0 = vpop.f32.mrf.mxu0 }
  0xe0   :  { %v497_v36 = vmul.f32 0.01, %v413_v25  ;;  %vm480_vm9 = vcmp.gt.f32.partialorder %v413_v25, 0.0  ;;  %v511_v45 = vsel %vm477_vm12, %v398_v43, %v494_v56  ;;  %v510_v63 = vsel %vm476_vm13, %v393_v48, %v493_v58  ;;  %v696_v43 = vld [vmem:[%s1713_s5 + $0x18] sm:$0xff] }
  0xe1   :  { %v417_v1 = vpop.f32.mrf.mxu1  ;;  %v1122_v2 = vpop.f32.mrf.mxu0  ;;  %v906_v48 = vld [vmem:[%s1715_s7 + $0x18] sm:$0xff] }
  0xe2   :  { %v418_v20 = vadd.f32 %v417_v1, %v212_v60  ;;  %v514_v53 = vsel %vm480_vm9, %v413_v25, %v497_v36  ;;  %v529_v2 = vld [vmem:[%s1712_s4 + $0x10] sm:$0xff] }
  0xe3   :  { %v1172_v3 = vpop.f32.mrf.mxu1  ;;  %v222_v4 = vpop.f32.mrf.mxu0 }
  0xe4   :  { %v498_v31 = vmul.f32 0.01, %v418_v20  ;;  %vm481_vm8 = vcmp.gt.f32.partialorder %v418_v20, 0.0 }
  0xe5   :  { %v422_v5 = vpop.f32.mrf.mxu1  ;;  %v1125_v6 = vpop.f32.mrf.mxu0 }
  0xe6   :  { %v423_v16 = vadd.f32 %v422_v5, %v217_v0  ;;  %v515_v47 = vsel %vm481_vm8, %v418_v20, %v498_v31  ;;  %v528_v0 = vld [vmem:[%s1712_s4 + $0x8] sm:$0xff]  ;;  %v531_v6 = vld [vmem:[%s1712_s4 + $0x20] sm:$0xff] }
  0xe7   :  { %v1175_v7 = vpop.f32.mrf.mxu1  ;;  %v227_v8 = vpop.f32.mrf.mxu0 }
  0xe8   :  { %v499_v26 = vmul.f32 0.01, %v423_v16  ;;  %vm482_vm7 = vcmp.gt.f32.partialorder %v423_v16, 0.0 }
  0xe9   :  { %v427_v9 = vpop.f32.mrf.mxu1  ;;  %v1128_v10 = vpop.f32.mrf.mxu0 }
  0xea   :  { %v428_v13 = vadd.f32 %v427_v9, %v222_v4  ;;  %v516_v37 = vsel %vm482_vm7, %v423_v16, %v499_v26  ;;  %v530_v4 = vld [vmem:[%s1712_s4 + $0x18] sm:$0xff]  ;;  %v533_v10 = vld [vmem:[%s1712_s4 + $0x30] sm:$0xff]  ;;  %vm701_vm7 = vcmask 523264  }
  0xeb   :  { %v1178_v11 = vpop.f32.mrf.mxu1  ;;  %v1593_v12 = vpop.f32.mrf.mxu0 }
  0xec   :  { %v500_v21 = vmul.f32 0.01, %v428_v13  ;;  %vm483_vm6 = vcmp.gt.f32.partialorder %v428_v13, 0.0 }
  0xed   :  { %v432_v14 = vpop.f32.mrf.mxu1  ;;  %v1131_v15 = vpop.f32.mrf.mxu0 }
  0xee   :  { %v433_v17 = vadd.f32 %v432_v14, %v227_v8  ;;  %v517_v32 = vsel %vm483_vm6, %v428_v13, %v500_v21  ;;  %v532_v8 = vld [vmem:[%s1712_s4 + $0x28] sm:$0xff] }
  0xef   :  { %v1181_v18 = vpop.f32.mrf.mxu1  ;;  %v1595_v19 = vpop.f32.mrf.mxu0 }
  0xf0   :  { %vm484_vm5 = vcmp.gt.f32.partialorder %v433_v17, 0.0  ;;  %v501_v22 = vmul.f32 0.01, %v433_v17 }
  0xf1   :  { %v1597_v23 = vpop.f32.mrf.mxu1  ;;  %v1134_v24 = vpop.f32.mrf.mxu0 }
  0xf2   :  { %v1599_v27 = vsel %vm484_vm5, %v433_v17, %v501_v22  ;;  %v534_v17 = vld [vmem:[%s1712_s4 + $0x38] sm:$0xff] }
  0xf3   :  { %v1184_v28 = vpop.f32.mrf.mxu1  ;;  %1206 = vmatprep.subr.msk.mxu0 %vm560_vm4, %v1599_v27  ;;  %v1603_v29 = vpop.f32.mrf.mxu0 }
  0xf4   :  { %1207 = vmatpush3.msk.msra.mxu0 %vm560_vm4, %v1599_v27 }
  0xf5   :  { %v1607_v33 = vpop.f32.mrf.mxu1  ;;  %1208 = vmatprep.subr.mxu0 %v517_v32  ;;  %v1137_v34 = vpop.f32.mrf.mxu0 }
  0xf6   :  { %1209 = vmatpush3.msra.mxu0 %v517_v32  ;;  %v443_v26 = vadd.f32 %v1607_v33, %v1595_v19  ;;  %v438_v32 = vadd.f32 %v1597_v23, %v1593_v12  ;;  %v693_v23 = vld [vmem:[%s1713_s5] sm:$0xff] }
  0xf7   :  { %v1187_v39 = vpop.f32.mrf.mxu1  ;;  %1210 = vmatprep.subr.mxu0 %v516_v37  ;;  %v1609_v42 = vpop.f32.mrf.mxu0 }
  0xf8   :  { %1211 = vmatpush3.msra.mxu0 %v516_v37  ;;  %v503_v35 = vmul.f32 0.01, %v443_v26  ;;  %vm486_vm6 = vcmp.gt.f32.partialorder %v443_v26, 0.0  ;;  %v502_v19 = vmul.f32 0.01, %v438_v32  ;;  %v694_v39 = vld [vmem:[%s1713_s5 + $0x8] sm:$0xff] }
  0xf9   :  { %v1613_v50 = vpop.f32.mrf.mxu1  ;;  %1212 = vmatprep.subr.mxu0 %v515_v47  ;;  %v1140_v51 = vpop.f32.mrf.mxu0 }
  0xfa   :  { %1213 = vmatpush3.msra.mxu0 %v515_v47  ;;  %v520_v37 = vsel %vm486_vm6, %v443_v26, %v503_v35  ;;  %v905_v47 = vld [vmem:[%s1715_s7 + $0x10] sm:$0xff]  ;;  %v904_v51 = vld [vmem:[%s1715_s7 + $0x8] sm:$0xff] }
  0xfb   :  { %v1190_v54 = vpop.f32.mrf.mxu1  ;;  %1214 = vmatprep.subr.mxu0 %v514_v53  ;;  %v252_v55 = vpop.f32.mrf.mxu0 }
  0xfc   :  { %1215 = vmatpush3.msra.mxu0 %v514_v53 }
  0xfd   :  { %v452_v49 = vpop.f32.mrf.mxu1  ;;  %1216 = vmatprep.subr.mxu0 %v513_v44  ;;  %v1143_v57 = vpop.f32.mrf.mxu0 }
  0xfe   :  { %1217 = vmatpush3.msra.mxu0 %v513_v44  ;;  %v453_v21 = vadd.f32 %v452_v49, %v1609_v42  ;;  %v697_v42 = vld [vmem:[%s1714_s6] sm:$0xff] }
  0xff   :  { %v1193_v60 = vpop.f32.mrf.mxu1  ;;  %1218 = vmatprep.subr.mxu0 %v512_v59  ;;  %v257_v40 = vpop.f32.mrf.mxu0  ;;  %1252 = vmatprep.mubr.msk.f32.mxu1 %vm701_vm7, %v697_v42 }
 0x100   :  { %1219 = vmatpush3.msra.mxu0 %v512_v59  ;;  %v505_v28 = vmul.f32 0.01, %v453_v21  ;;  %vm488_vm2 = vcmp.gt.f32.partialorder %v453_v21, 0.0 }
 0x101   :  { %v457_v61 = vpop.f32.mrf.mxu1  ;;  %1220 = vmatprep.subr.mxu0 %v511_v45  ;;  %v1146_v62 = vpop.f32.mrf.mxu0 }
 0x102   :  { %1221 = vmatpush3.msra.mxu0 %v511_v45  ;;  %v458_v15 = vadd.f32 %v457_v61, %v252_v55  ;;  %v522_v36 = vsel %vm488_vm2, %v453_v21, %v505_v28 }
 0x103   :  { %v1196_v1 = vpop.f32.mrf.mxu1  ;;  %1222 = vmatprep.subr.mxu0 %v510_v63 }
 0x104   :  { %1223 = vmatpush3.msra.mxu0 %v510_v63  ;;  %vm489_vm1 = vcmp.gt.f32.partialorder %v458_v15, 0.0 }
 0x105   :  { %v462_v3 = vpop.f32.mrf.mxu1  ;;  %1225 = vmatmul.mubr.msk.f32.vlgmr.msra.gmra.mxu0 %vm535_vm3, %v528_v0 }
 0x106   :  { %1227 = vmatprep.mubr.msk.f32.mxu0 %vm535_vm3, %v529_v2  ;;  %v463_v11 = vadd.f32 %v462_v3, %v257_v40 }
 0x107   :  { %v1199_v5 = vpop.f32.mrf.mxu1 }
 0x108   :  { %v507_v18 = vmul.f32 0.01, %v463_v11  ;;  %vm490_vm0 = vcmp.gt.f32.partialorder %v463_v11, 0.0 }
 0x109   :  { %v467_v7 = vpop.f32.mrf.mxu1  ;;  %1228 = vmatmul.mubr.msk.f32.gmra.mxu0 %vm535_vm3, %v530_v4 }
 0x10a   :  { %1230 = vmatprep.mubr.msk.f32.mxu0 %vm535_vm3, %v531_v6  ;;  %v468_v13 = vadd.f32 %v467_v7, %v1581_v38  ;;  %v448_v38 = vadd.f32 %v1613_v50, %v1603_v29  ;;  %v524_v31 = vsel %vm490_vm0, %v463_v11, %v507_v18  ;;  %v1314_v50 = vmov 0   ;;  %v700_v11 = vld [vmem:[%s1714_s6 + $0x18] sm:$0xff] }
 0x10b   :  { %v1202_v9 = vpop.f32.mrf.mxu1  ;;  %1288 = vset.pattern.permute.xlu0 %v1314_v50  ;;  %1289 = vset.pattern.permute.xlu1 %v1314_v50  ;;  %vm952_vm0 = vcmask 8192  }
 0x10c   :  { %v508_v22 = vmul.f32 0.01, %v468_v13  ;;  %vm491_vm15 = vcmp.gt.f32.partialorder %v468_v13, 0.0  ;;  %v504_v34 = vmul.f32 0.01, %v448_v38  ;;  %vm487_vm5 = vcmp.gt.f32.partialorder %v448_v38, 0.0  ;;  %910 = vperm.xlu0 %1288, %v903_v46   ;;  %920 = vperm.xlu1 %1289, %v905_v47  }
 0x10d   :  { %v472_v14 = vpop.f32.mrf.mxu1  ;;  %1231 = vmatmul.mubr.msk.f32.gmra.mxu0 %vm535_vm3, %v532_v8  ;;  %v698_v9 = vld [vmem:[%s1714_s6 + $0x8] sm:$0xff] }
 0x10e   :  { %v473_v16 = vadd.f32 %v472_v14, %v1585_v41  ;;  %1233 = vmatprep.mubr.msk.f32.mxu0 %vm535_vm3, %v533_v10  ;;  %v506_v41 = vmul.f32 0.01, %v458_v15  ;;  %v525_v30 = vsel %vm491_vm15, %v468_v13, %v508_v22  ;;  %v521_v33 = vsel %vm487_vm5, %v448_v38, %v504_v34  ;;  %v699_v10 = vld [vmem:[%s1714_s6 + $0x10] sm:$0xff]  ;;  %s1315_s6 = smov [#allocation2]  }
 0x10f   :  { %v1205_v20 = vpop.f32.mrf.mxu1  ;;  %vm932_vm15 = vcmask 15360   ;;  %s960_s14 = sshll.u32 %s1315_s6, 4  ;;  %s961_s14 = int_to_ptr.vmem [resolvable:$true] %s960_s14 }
 0x110   :  { %vm492_vm14 = vcmp.gt.f32.partialorder %v473_v16, 0.0  ;;  %v509_v24 = vmul.f32 0.01, %v473_v16  ;;  %v523_v29 = vsel %vm489_vm1, %v458_v15, %v506_v41  ;;  %915 = vperm.xlu0 %1288, %v904_v51   ;;  %925 = vperm.xlu1 %1289, %v906_v48   ;;  %s1290_s15 = scalar_lea.vmem %s961_s14, 16  ;;  %s1294_s16 = scalar_lea.vmem %s961_s14, 32 }
 0x111   :  { %1234 = vmatmul.mubr.msk.f32.gmra.mxu0 %vm535_vm3, %v534_v17  ;;  %p1291_p0 = scmp.ne.s32.totalorder %s961_s14, %s1290_s15  ;;  %p1295_p1 = scmp.lt.s32.totalorder %s961_s14, %s961_s14 }
 0x112   :  { %v526_v25 = vsel %vm492_vm14, %v473_v16, %v509_v24  ;;  %1276 = vmatprep.mubr.msk.f32.mxu0 %vm535_vm3, %v693_v23  ;;  %p1296_p2 = scmp.lt.s32.totalorder %s1294_s16, %s1290_s15 }
 0x113   :  { %1258 = vmatprep.subr.msk.mxu0 %vm560_vm4, %v526_v25 }
 0x114   :  { %1259 = vmatpush3.msk.msra.mxu0 %vm560_vm4, %v526_v25  ;;  %vm485_vm4 = vcmp.gt.f32.partialorder %v438_v32, 0.0  ;;  %948 = vperm.xlu0 %1288, %v907_v52   ;;  %p1297_p3 = por %p1296_p2, %p1295_p1 }
 0x115   :  { %1260 = vmatprep.subr.mxu0 %v525_v30  ;;  %v519_v12 = vsel %vm485_vm4, %v438_v32, %v502_v19 }
 0x116   :  { %1261 = vmatpush3.msra.mxu0 %v525_v30  ;;  %p1298_p4 = pnand %p1297_p3, %p1291_p0 }
 0x117   :  { %1262 = vmatprep.subr.mxu0 %v524_v31 }
 0x118   :  { %1263 = vmatpush3.msra.mxu0 %v524_v31 }
 0x119   :  { %1264 = vmatprep.subr.mxu0 %v523_v29 }
 0x11a   :  { %1265 = vmatpush3.msra.mxu0 %v523_v29 }
 0x11b   :  { %1266 = vmatprep.subr.mxu0 %v522_v36 }
 0x11c   :  { %1267 = vmatpush3.msra.mxu0 %v522_v36 }
 0x11d   :  { %1268 = vmatprep.subr.mxu0 %v521_v33 }
 0x11e   :  { %1269 = vmatpush3.msra.mxu0 %v521_v33 }
 0x11f   :  { %1270 = vmatprep.subr.mxu0 %v520_v37 }
 0x120   :  { %1271 = vmatpush3.msra.mxu0 %v520_v37 }
 0x121   :  { %1272 = vmatprep.subr.mxu0 %v519_v12 }
 0x122   :  { %1273 = vmatpush3.msra.mxu0 %v519_v12 }
 0x123   :  { %1274 = vmatprep.subr.mxu0 %v1599_v27 }
 0x124   :  { %1275 = vmatpush3.msra.mxu0 %v1599_v27  ;;  %v695_v27 = vld [vmem:[%s1713_s5 + $0x10] sm:$0xff] }
 0x125   :  { %1277 = vmatmul.mubr.msk.f32.vlgmr.msra.gmra.mxu0 %vm535_vm3, %v694_v39 }
 0x126   :  { %1279 = vmatprep.mubr.msk.f32.mxu0 %vm535_vm3, %v695_v27 }
 0x129   :  { %1280 = vmatmul.mubr.msk.f32.gmra.mxu0 %vm535_vm3, %v696_v43 }
 0x187   :  { %v911_v15 = vpop.permute.xlu0 %910  ;;  %v921_v21 = vpop.permute.xlu1 %920 }
 0x18b   :  { %v916_v26 = vpop.permute.xlu0 %915  ;;  %v926_v35 = vpop.permute.xlu1 %925 }
 0x1c5   :  { %v1226_v53 = vpop.f32.mrf.mxu0 }
 0x1c6   :  { %v678_v3 = vmul.f32 0.01, %v1226_v53  ;;  %vm670_vm13 = vcmp.gt.f32.partialorder %v1226_v53, 0.0 }
 0x1c7   :  { %v630_v54 = vpop.f32.mrf.mxu0 }
 0x1c8   :  { %v677_v5 = vmul.f32 0.01, %v630_v54  ;;  %vm669_vm14 = vcmp.gt.f32.partialorder %v630_v54, 0.0  ;;  %v686_v7 = vsel %vm670_vm13, %v1226_v53, %v678_v3  ;;  %v949_v53 = vpop.permute.xlu0 %948 }
 0x1c9   :  { %v1229_v55 = vpop.f32.mrf.mxu0 }
 0x1ca   :  { %v680_v63 = vmul.f32 0.01, %v1229_v55  ;;  %vm672_vm11 = vcmp.gt.f32.partialorder %v1229_v55, 0.0  ;;  %v685_v8 = vsel %vm669_vm14, %v630_v54, %v677_v5 }
 0x1cb   :  { %v640_v56 = vpop.f32.mrf.mxu0 }
 0x1cc   :  { %v679_v1 = vmul.f32 0.01, %v640_v56  ;;  %vm671_vm12 = vcmp.gt.f32.partialorder %v640_v56, 0.0  ;;  %v688_v4 = vsel %vm672_vm11, %v1229_v55, %v680_v63 }
 0x1cd   :  { %v1232_v44 = vpop.f32.mrf.mxu0 }
 0x1ce   :  { %v682_v60 = vmul.f32 0.01, %v1232_v44  ;;  %vm674_vm9 = vcmp.gt.f32.partialorder %v1232_v44, 0.0  ;;  %v687_v6 = vsel %vm671_vm12, %v640_v56, %v679_v1 }
 0x1cf   :  { %v650_v49 = vpop.f32.mrf.mxu0 }
 0x1d0   :  { %v681_v61 = vmul.f32 0.01, %v650_v49  ;;  %vm673_vm10 = vcmp.gt.f32.partialorder %v650_v49, 0.0  ;;  %v690_v0 = vsel %vm674_vm9, %v1232_v44, %v682_v60 }
 0x1d1   :  { %v1235_v57 = vpop.f32.mrf.mxu0 }
 0x1d2   :  { %vm676_vm3 = vcmp.gt.f32.partialorder %v1235_v57, 0.0  ;;  %v684_v58 = vmul.f32 0.01, %v1235_v57  ;;  %v689_v2 = vsel %vm673_vm10, %v650_v49, %v681_v61 }
 0x1d3   :  { %v660_v59 = vpop.f32.mrf.mxu0 }
 0x1d4   :  { %vm675_vm8 = vcmp.gt.f32.partialorder %v660_v59, 0.0  ;;  %v683_v40 = vmul.f32 0.01, %v660_v59  ;;  %v692_v45 = vsel %vm676_vm3, %v1235_v57, %v684_v58 }
 0x1d5   :  { %1236 = vmatprep.subr.mxu1 %v692_v45 }
 0x1d6   :  { %1237 = vmatpush3.msra.mxu1 %v692_v45  ;;  %v691_v62 = vsel %vm675_vm8, %v660_v59, %v683_v40 }
 0x1d7   :  { %1238 = vmatprep.subr.mxu1 %v691_v62 }
 0x1d8   :  { %1239 = vmatpush3.msra.mxu1 %v691_v62 }
 0x1d9   :  { %1240 = vmatprep.subr.mxu1 %v690_v0 }
 0x1da   :  { %1241 = vmatpush3.msra.mxu1 %v690_v0 }
 0x1db   :  { %1242 = vmatprep.subr.mxu1 %v689_v2 }
 0x1dc   :  { %1243 = vmatpush3.msra.mxu1 %v689_v2 }
 0x1dd   :  { %1244 = vmatprep.subr.mxu1 %v688_v4 }
 0x1de   :  { %1245 = vmatpush3.msra.mxu1 %v688_v4 }
 0x1df   :  { %1246 = vmatprep.subr.mxu1 %v687_v6 }
 0x1e0   :  { %1247 = vmatpush3.msra.mxu1 %v687_v6 }
 0x1e1   :  { %1248 = vmatprep.subr.mxu1 %v686_v7 }
 0x1e2   :  { %1249 = vmatpush3.msra.mxu1 %v686_v7 }
 0x1e3   :  { %1250 = vmatprep.subr.mxu1 %v685_v8 }
 0x1e4   :  { %1251 = vmatpush3.msra.mxu1 %v685_v8 }
 0x1e5   :  { %1253 = vmatmul.mubr.msk.f32.vlgmr.msra.gmra.mxu1 %vm701_vm7, %v698_v9  ;;  %v1278_v13 = vpop.f32.mrf.mxu0 }
 0x1e6   :  { %1255 = vmatprep.mubr.msk.f32.mxu1 %vm701_vm7, %v699_v10 }
 0x1e7   :  { %v880_v14 = vpop.f32.mrf.mxu0 }
 0x1e9   :  { %1256 = vmatmul.mubr.msk.f32.gmra.mxu1 %vm701_vm7, %v700_v11  ;;  %v1281_v18 = vpop.f32.mrf.mxu0 }
 0x1eb   :  { %v890_v30 = vpop.f32.mrf.mxu0 }
 0x2a5   :  { %v1254_v16 = vpop.f32.mrf.mxu1 }
 0x2a6   :  { %v886_v17 = vadd.f32 %v1278_v13, %v1254_v16 }
 0x2a7   :  { %v780_v20 = vpop.f32.mrf.mxu1 }
 0x2a8   :  { %v900_v22 = vmax.f32 %v886_v17, 0.0  ;;  %v881_v24 = vadd.f32 %v880_v14, %v780_v20 }
 0x2a9   :  { %v1257_v38 = vpop.f32.mrf.mxu1 }
 0x2aa   :  { %v899_v41 = vmax.f32 %v881_v24, 0.0  ;;  %v896_v25 = vadd.f32 %v1281_v18, %v1257_v38  ;;  %v929_v29 = vmul.f32 %v916_v26, %v900_v22 }
 0x2ab   :  { %v790_v28 = vpop.f32.mrf.mxu1 }
 0x2ac   :  { %v928_v31 = vmul.f32 %v911_v15, %v899_v41  ;;  %v902_v32 = vmax.f32 %v896_v25, 0.0  ;;  %v891_v34 = vadd.f32 %v890_v30, %v790_v28  ;;  %v934_v37 = vsel %vm932_vm15, %v929_v29, 0.0 }
 0x2ae   :  { %v933_v36 = vsel %vm932_vm15, %v928_v31, 0.0  ;;  %v901_v19 = vmax.f32 %v891_v34, 0.0  ;;  %v931_v12 = vmul.f32 %v926_v35, %v902_v32 }
 0x2af   :  { %v935_v23 = vadd.f32 %v934_v37, %v933_v36 }
 0x2b0   :  { %v930_v33 = vmul.f32 %v921_v21, %v901_v19  ;;  %v938_v27 = vsel %vm932_vm15, %v931_v12, 0.0 }
 0x2b2   :  { %v936_v39 = vsel %vm932_vm15, %v930_v33, 0.0 }
 0x2b3   :  { %v937_v42 = vadd.f32 %v936_v39, %v935_v23 }
 0x2b5   :  { %v939_v43 = vadd.f32 %v938_v27, %v937_v42 }
 0x2b7   :  { %v940_v46 = vrot.slane %v939_v43, 4 }
 0x2b9   :  { %v941_v47 = vadd.f32 %v940_v46, %v939_v43 }
 0x2bb   :  { %v942_v50 = vrot.slane %v941_v47, 2 }
 0x2bd   :  { %v943_v51 = vadd.f32 %v942_v50, %v941_v47 }
 0x2bf   :  { %v944_v48 = vrot.slane %v943_v51, 1 }
 0x2c1   :  { %v945_v52 = vadd.f32 %v944_v48, %v943_v51 }
 0x2c3   :  { %v951_v54 = vadd.f32 %v949_v53, %v945_v52 }
 0x2c5   :  { %953 = vst.msk [vmem:[#allocation2] sm:$0x1] %vm952_vm0, %v951_v54 }
 0x2c6   :  { %1301 = shalt.err (!%p1298_p4)
}
 0x2c7   :  { %963 = dma.vmem_to_hbm [thread:$0]  %s961_s14, 16, %s1716_s8, [#allocation3]  }
 0x2c8   :  { %1310 = dma.done.wait [#allocation3], 16  }
 0x2c9   :  { %1311 = vsyncadd [#allocation3], 4294967280 }
 0x2ca   :  { %967 = vsyncpa [#allocation3], 1 }

</bundles_post_ra>
